<compile_context>
chip_gen: v7x
topology: tpu7x:2x2x1
jax: 0.10.0
libtpu: 0.0.40
codegen_flags: <defaults>
</compile_context>

<pallas_src>
import functools
import jax
import jax.numpy as jnp
from jax.experimental import pallas as pl
from jax.experimental.pallas import tpu as pltpu


MATMUL_DTYPE = jnp.bfloat16          # MXU input dtype (f32 accumulation)
VMEM_LIMIT_BYTES = 48 * 1024 * 1024  # < v7x 64 MiB; raises v5e/v6e scoped default
NEG_INF = -1e30                      # f32 mask constant (scores stay f32)


# ----------------------------------------------------------------------------
# Helpers
# ----------------------------------------------------------------------------

def _pick_tile(n, candidates=(512, 256, 128, 64, 32, 16, 8)):
    """Largest candidate tile that evenly divides n (falls back to n)."""
    for c in candidates:
        if c <= n and n % c == 0:
            return c
    return n


def _cparams(dim_sem):
    return pltpu.CompilerParams(dimension_semantics=dim_sem,
                                vmem_limit_bytes=VMEM_LIMIT_BYTES)


def _ln(x, g, b, eps=1e-5):
    mean = jnp.mean(x, axis=-1, keepdims=True)
    var = jnp.mean(jnp.square(x - mean), axis=-1, keepdims=True)
    return (x - mean) * jax.lax.rsqrt(var + eps) * g + b


# ----------------------------------------------------------------------------
# Pallas kernels
# ----------------------------------------------------------------------------

def _ln_matmul_kernel(*refs, act, has_bias):
    """o = act(LN(x) @ W [+ b]) — fused pre-norm projection."""
    if has_bias:
        x_ref, g_ref, bt_ref, w_ref, b_ref, o_ref = refs
    else:
        x_ref, g_ref, bt_ref, w_ref, o_ref = refs
        b_ref = None
    x = x_ref[...].astype(jnp.float32)
    h = _ln(x, g_ref[...], bt_ref[...])
    y = jnp.dot(h.astype(MATMUL_DTYPE), w_ref[...].astype(MATMUL_DTYPE),
                preferred_element_type=jnp.float32)
    if b_ref is not None:
        y = y + b_ref[...]
    if act == "gelu":
        # NOTE: tanh-approx GELU (Mosaic-safe); PyTorch nn.GELU default is
        # exact erf — max abs difference ~1e-3.
        y = jax.nn.gelu(y)
    o_ref[...] = y.astype(o_ref.dtype)


def ln_matmul(x2d, gamma, beta, w, bias=None, act=None):
    M, D = x2d.shape
    N = w.shape[1]
    bm = _pick_tile(M)
    in_specs = [
        pl.BlockSpec((bm, D), lambda i: (i, 0)),
        pl.BlockSpec((1, D), lambda i: (0, 0)),
        pl.BlockSpec((1, D), lambda i: (0, 0)),
        pl.BlockSpec((D, N), lambda i: (0, 0)),   # weight stays VMEM-resident
    ]
    args = [x2d, gamma.reshape(1, D), beta.reshape(1, D), w]
    if bias is not None:
        in_specs.append(pl.BlockSpec((1, N), lambda i: (0, 0)))
        args.append(bias.reshape(1, N))
    return pl.pallas_call(
        functools.partial(_ln_matmul_kernel, act=act, has_bias=bias is not None),
        out_shape=jax.ShapeDtypeStruct((M, N), x2d.dtype),
        grid=(M // bm,),
        in_specs=in_specs,
        out_specs=pl.BlockSpec((bm, N), lambda i: (i, 0)),
        compiler_params=_cparams(("parallel",)),
    )(*args)


def _proj_residual_kernel(a_ref, w_ref, r_ref, o_ref):
    """o = r + a @ W  (attention output projection fused with residual)."""
    y = jnp.dot(a_ref[...].astype(MATMUL_DTYPE), w_ref[...].astype(MATMUL_DTYPE),
                preferred_element_type=jnp.float32)
    o_ref[...] = (r_ref[...].astype(jnp.float32) + y).astype(o_ref.dtype)


def proj_residual(a2d, w, res2d):
    M, K = a2d.shape
    N = w.shape[1]
    bm = _pick_tile(M)
    return pl.pallas_call(
        _proj_residual_kernel,
        out_shape=jax.ShapeDtypeStruct((M, N), res2d.dtype),
        grid=(M // bm,),
        in_specs=[pl.BlockSpec((bm, K), lambda i: (i, 0)),
                  pl.BlockSpec((K, N), lambda i: (0, 0)),
                  pl.BlockSpec((bm, N), lambda i: (i, 0))],
        out_specs=pl.BlockSpec((bm, N), lambda i: (i, 0)),
        compiler_params=_cparams(("parallel",)),
    )(a2d, w, res2d)


def _ff_block_kernel(x_ref, g_ref, bt_ref, w1_ref, b1_ref, w2_ref, b2_ref, o_ref):
    """o = x + FF2(gelu(FF1(LN(x)))) — 4x-wide hidden never leaves VMEM."""
    x = x_ref[...].astype(jnp.float32)
    h = _ln(x, g_ref[...], bt_ref[...])
    h = jnp.dot(h.astype(MATMUL_DTYPE), w1_ref[...].astype(MATMUL_DTYPE),
                preferred_element_type=jnp.float32) + b1_ref[...]
    h = jax.nn.gelu(h)
    y = jnp.dot(h.astype(MATMUL_DTYPE), w2_ref[...].astype(MATMUL_DTYPE),
                preferred_element_type=jnp.float32) + b2_ref[...]
    o_ref[...] = (x + y).astype(o_ref.dtype)


def ff_block(x2d, gamma, beta, w1, b1, w2, b2):
    M, D = x2d.shape
    H = w1.shape[1]
    bm = _pick_tile(M)
    return pl.pallas_call(
        _ff_block_kernel,
        out_shape=jax.ShapeDtypeStruct((M, D), x2d.dtype),
        grid=(M // bm,),
        in_specs=[pl.BlockSpec((bm, D), lambda i: (i, 0)),
                  pl.BlockSpec((1, D), lambda i: (0, 0)),
                  pl.BlockSpec((1, D), lambda i: (0, 0)),
                  pl.BlockSpec((D, H), lambda i: (0, 0)),
                  pl.BlockSpec((1, H), lambda i: (0, 0)),
                  pl.BlockSpec((H, D), lambda i: (0, 0)),
                  pl.BlockSpec((1, D), lambda i: (0, 0))],
        out_specs=pl.BlockSpec((bm, D), lambda i: (i, 0)),
        compiler_params=_cparams(("parallel",)),
    )(x2d, gamma.reshape(1, D), beta.reshape(1, D),
      w1, b1.reshape(1, H), w2, b2.reshape(1, D))


def _layernorm_kernel(x_ref, g_ref, b_ref, o_ref):
    x = x_ref[...].astype(jnp.float32)
    o_ref[...] = _ln(x, g_ref[...], b_ref[...]).astype(o_ref.dtype)


def layernorm(x2d, gamma, beta):
    M, D = x2d.shape
    bm = _pick_tile(M)
    return pl.pallas_call(
        _layernorm_kernel,
        out_shape=jax.ShapeDtypeStruct((M, D), x2d.dtype),
        grid=(M // bm,),
        in_specs=[pl.BlockSpec((bm, D), lambda i: (i, 0)),
                  pl.BlockSpec((1, D), lambda i: (0, 0)),
                  pl.BlockSpec((1, D), lambda i: (0, 0))],
        out_specs=pl.BlockSpec((bm, D), lambda i: (i, 0)),
        compiler_params=_cparams(("parallel",)),
    )(x2d, gamma.reshape(1, D), beta.reshape(1, D))


def _flash_attn_kernel(q_ref, k_ref, v_ref, o_ref, m_sc, l_sc, acc_sc,
                       *, scale, tq, tk):
    """Causal flash attention; grid = (batch*heads, q_tiles, kv_tiles)."""
    qi = pl.program_id(1)
    ki = pl.program_id(2)
    nk = pl.num_programs(2)

    @pl.when(ki == 0)
    def _init():
        m_sc[...] = jnp.full_like(m_sc, NEG_INF)
        l_sc[...] = jnp.zeros_like(l_sc)
        acc_sc[...] = jnp.zeros_like(acc_sc)

    # Skip kv tiles strictly in the future (fully masked by causality).
    @pl.when(ki * tk <= qi * tq + (tq - 1))
    def _compute():
        q = q_ref[0].astype(MATMUL_DTYPE)
        k = k_ref[0].astype(MATMUL_DTYPE)
        v = v_ref[0].astype(MATMUL_DTYPE)
        # s = q @ k^T (contract head dim of both), f32 accumulation.
        s = jax.lax.dot_general(q, k, (((1,), (1,)), ((), ())),
                                preferred_element_type=jnp.float32) * scale
        q_pos = qi * tq + jax.lax.broadcasted_iota(jnp.int32, (tq, tk), 0)
        k_pos = ki * tk + jax.lax.broadcasted_iota(jnp.int32, (tq, tk), 1)
        s = jnp.where(k_pos > q_pos, NEG_INF, s)

        m_prev = m_sc[...]
        m_new = jnp.maximum(m_prev, jnp.max(s, axis=-1, keepdims=True))
        alpha = jnp.exp(m_prev - m_new)
        p = jnp.exp(s - m_new)
        l_sc[...] = alpha * l_sc[...] + jnp.sum(p, axis=-1, keepdims=True)
        acc_sc[...] = alpha * acc_sc[...] + jnp.dot(
            p.astype(MATMUL_DTYPE), v, preferred_element_type=jnp.float32)
        m_sc[...] = m_new

    @pl.when(ki == nk - 1)
    def _finalize():
        inv = pl.reciprocal(l_sc[...], approx=True)
        o_ref[0] = (acc_sc[...] * inv).astype(o_ref.dtype)


def flash_attention(q, k, v, scale):
    """q, k, v: (batch*heads, seq, dim_head) -> same shape."""
    BH, S, dh = q.shape
    tq = _pick_tile(S, (256, 128, 64, 32, 16, 8))
    tk = tq
    grid = (BH, S // tq, S // tk)
    q_spec = pl.BlockSpec((1, tq, dh), lambda b, i, j: (b, i, 0))
    kv_spec = pl.BlockSpec((1, tk, dh), lambda b, i, j: (b, j, 0))
    return pl.pallas_call(
        functools.partial(_flash_attn_kernel, scale=scale, tq=tq, tk=tk),
        out_shape=jax.ShapeDtypeStruct(q.shape, q.dtype),
        grid=grid,
        in_specs=[q_spec, kv_spec, kv_spec],
        out_specs=pl.BlockSpec((1, tq, dh), lambda b, i, j: (b, i, 0)),
        scratch_shapes=[pltpu.VMEM((tq, 1), jnp.float32),
                        pltpu.VMEM((tq, 1), jnp.float32),
                        pltpu.VMEM((tq, dh), jnp.float32)],
        compiler_params=_cparams(("parallel", "parallel", "arbitrary")),
    )(q, k, v)


# ----------------------------------------------------------------------------
# Model: parameters + forward
# ----------------------------------------------------------------------------

def init_params(key, *, n_tokens, max_seq_len, dim, heads, depth, ff_mult):
    ks = iter(jax.random.split(key, 128))
    dim_head = dim // heads
    wdt = MATMUL_DTYPE
    p = {"n_tokens": list(n_tokens), "dim": dim, "heads": heads,
         "dim_head": dim_head}

    # multi-field token embeddings (kaiming-normal-ish deterministic init)
    p["tok_emb"] = [
        jax.random.normal(next(ks), (n_, dim), jnp.float32) * (2.0 / dim) ** 0.5
        for n_ in n_tokens
    ]
    # absolute positional embedding (x-transformers scales it by dim**-0.5)
    p["pos_emb"] = jax.random.normal(next(ks), (max_seq_len, dim), jnp.float32) * 0.02

    layers = []
    for _ in range(depth):
        wq = jax.random.normal(next(ks), (dim, dim), jnp.float32) * dim ** -0.5
        wk = jax.random.normal(next(ks), (dim, dim), jnp.float32) * dim ** -0.5
        wv = jax.random.normal(next(ks), (dim, dim), jnp.float32) * dim ** -0.5
        layers.append({
            "ln1_g": jnp.ones((dim,), jnp.float32),
            "ln1_b": jnp.zeros((dim,), jnp.float32),
            "w_qkv": jnp.concatenate([wq, wk, wv], axis=1).astype(wdt),
            "wo": (jax.random.normal(next(ks), (dim, dim), jnp.float32)
                   * dim ** -0.5).astype(wdt),
            "ln2_g": jnp.ones((dim,), jnp.float32),
            "ln2_b": jnp.zeros((dim,), jnp.float32),
            "ff_w1": (jax.random.normal(next(ks), (dim, dim * ff_mult), jnp.float32)
                      * dim ** -0.5).astype(wdt),
            "ff_b1": jnp.zeros((dim * ff_mult,), jnp.float32),
            "ff_w2": (jax.random.normal(next(ks), (dim * ff_mult, dim), jnp.float32)
                      * (dim * ff_mult) ** -0.5).astype(wdt),
            "ff_b2": jnp.zeros((dim,), jnp.float32),
        })
    p["layers"] = layers

    # final norm (wrapper's self.norm)
    p["norm_g"] = jnp.ones((dim,), jnp.float32)
    p["norm_b"] = jnp.zeros((dim,), jnp.float32)

    # to_logits heads concatenated into ONE lane-padded matmul (>=128 wide).
    ws, bs = [], []
    for n_ in n_tokens:
        ws.append(jax.random.normal(next(ks), (dim, n_), jnp.float32) * dim ** -0.5)
        bs.append(jnp.zeros((n_,), jnp.float32))
    total = sum(n_tokens)
    pad = (-total) % 128
    w_cat = jnp.concatenate(ws, axis=1)
    b_cat = jnp.concatenate(bs)
    if pad:
        w_cat = jnp.pad(w_cat, ((0, 0), (0, pad)))
        b_cat = jnp.pad(b_cat, (0, pad))
    p["logits_w"] = w_cat.astype(wdt)
    p["logits_b"] = b_cat
    return p


def music_transformer_forward(params, x_tokens, return_embeddings=False):
    """x_tokens: (b, n, n_fields) int32 -> list of (b, n, n_tokens_i) logits."""
    b, n, _ = x_tokens.shape
    dim = params["dim"]
    heads = params["heads"]
    dh = params["dim_head"]

    # --- token embedding: sum over fields of clamped lookups (JAX gather)
    # TODO(synk): embedding gather stays in plain JAX (no clean blockwise
    # Pallas equivalent without a scalar-prefetch DMA gather).
    x = jnp.zeros((b, n, dim), jnp.float32)
    for i, table in enumerate(params["tok_emb"]):
        idx = jnp.clip(x_tokens[..., i], 0, table.shape[0] - 1)
        x = x + jnp.take(table, idx, axis=0)

    # absolute positional embedding (scaled dim**-0.5 as in x-transformers
    # AbsolutePositionalEmbedding with l2norm_embed=False); emb_dropout = id.
    x = x + params["pos_emb"][:n] * (dim ** -0.5)
    # project_embedding is nn.Identity (emb_dim == dim)

    x2d = x.reshape(b * n, dim)

    def split_heads(t):
        return (t.reshape(b, n, heads, dh).transpose(0, 2, 1, 3)
                 .reshape(b * heads, n, dh))

    # --- pre-norm causal decoder blocks
    for lyr in params["layers"]:
        # fused LN + QKV projection (no bias)
        qkv = ln_matmul(x2d, lyr["ln1_g"], lyr["ln1_b"], lyr["w_qkv"])
        q = qkv[:, :dim]
        k = qkv[:, dim:2 * dim]
        v = qkv[:, 2 * dim:]

        # TODO(synk): head split/merge transposes stay in JAX; folding them
        # into the attention kernel would save two activation HBM passes.
        o = flash_attention(split_heads(q), split_heads(k), split_heads(v),
                            scale=dh ** -0.5)
        o2d = (o.reshape(b, heads, n, dh).transpose(0, 2, 1, 3)
                .reshape(b * n, dim))

        # output projection fused with residual add
        x2d = proj_residual(o2d, lyr["wo"], x2d)

        # fused LN + FF1(gelu) + FF2 + residual
        x2d = ff_block(x2d, lyr["ln2_g"], lyr["ln2_b"],
                       lyr["ff_w1"], lyr["ff_b1"], lyr["ff_w2"], lyr["ff_b2"])

    if return_embeddings:
        return layernorm(x2d, params["norm_g"], params["norm_b"]).reshape(b, n, dim)

    # --- fused final LN + all logits heads in one lane-dense matmul
    logits_cat = ln_matmul(x2d, params["norm_g"], params["norm_b"],
                           params["logits_w"], bias=params["logits_b"])
    outputs = []
    off = 0
    for nt in params["n_tokens"]:
        outputs.append(logits_cat[:, off:off + nt].reshape(b, n, nt))
        off += nt
    return outputs


# ----------------------------------------------------------------------------
# Main
# ----------------------------------------------------------------------------

if __name__ == "__main__":
    # Small deterministic config consistent with the module's __init__:
    #   multi-dimensional encoding (unidimensional=False), no memory tokens,
    #   no mems, eval-mode dropout.
    encoding = {
        "n_tokens": [6, 9, 12, 5],
        "dimensions": ["type", "beat", "position", "pitch"],
        "use_absolute_time": False,
    }
    max_seq_len = 8
    dim = 32
    heads = 4
    depth = 2
    ff_mult = 4
    batch = 2
    seq = 8

    key = jax.random.PRNGKey(0)
    k_param, k_data = jax.random.split(key)

    params = init_params(
        k_param,
        n_tokens=encoding["n_tokens"],
        max_seq_len=max_seq_len,
        dim=dim,
        heads=heads,
        depth=depth,
        ff_mult=ff_mult,
    )

    # token ids: (batch, seq, n_fields); some values exceed the vocab to
    # exercise the clamp semantics of the reference forward.
    x_tokens = jax.random.randint(
        k_data, (batch, seq, len(encoding["n_tokens"])), minval=0, maxval=15,
        dtype=jnp.int32)

    # TODO(synk): return_mems / return_attn / memory-token / mems paths are not
    # exercised (num_memory_token=0, mems=None), matching the default forward.
    outputs = music_transformer_forward(params, x_tokens)
    outputs = jax.block_until_ready(outputs)

    expected_shapes = [(batch, seq, n) for n in encoding["n_tokens"]]
    got_shapes = [tuple(o.shape) for o in outputs]
    assert got_shapes == expected_shapes, (got_shapes, expected_shapes)
    assert all(bool(jnp.all(jnp.isfinite(o))) for o in outputs)

    print("KERNEL_OK")
</pallas_src>

<mosaic_0001>
module attributes {stable_mosaic.version = 11 : i64} {
  func.func @_ln_matmul_kernel(%arg0: i32, %arg1: memref<16x32xf32, #tpu.memory_space<vmem>>, %arg2: memref<1x32xf32, #tpu.memory_space<vmem>>, %arg3: memref<1x32xf32, #tpu.memory_space<vmem>>, %arg4: memref<32x96xbf16, #tpu.memory_space<vmem>>, %arg5: memref<16x96xf32, #tpu.memory_space<vmem>>) attributes {dimension_semantics = [#tpu.dimension_semantics<parallel>], iteration_bounds = array<i64: 1>, scalar_prefetch = 0 : i64, scratch_operands = 0 : i64, tpu.core_type = #tpu.core_type<tc>, window_params = [{transform_indices = @transform_0, window_bounds = array<i64: 16, 32>}, {pipeline_mode = #tpu.pipeline_mode<synchronous>, transform_indices = @transform_1, window_bounds = array<i64: 1, 32>}, {pipeline_mode = #tpu.pipeline_mode<synchronous>, transform_indices = @transform_2, window_bounds = array<i64: 1, 32>}, {pipeline_mode = #tpu.pipeline_mode<synchronous>, transform_indices = @transform_3, window_bounds = array<i64: 32, 96>}, {transform_indices = @transform_4, window_bounds = array<i64: 16, 96>}]} {
    %c0 = arith.constant 0 : index
    %c0_0 = arith.constant 0 : index
    %0 = vector.load %arg1[%c0, %c0_0] : memref<16x32xf32, #tpu.memory_space<vmem>>, vector<16x32xf32>
    %c0_1 = arith.constant 0 : index
    %c0_2 = arith.constant 0 : index
    %1 = vector.load %arg2[%c0_1, %c0_2] : memref<1x32xf32, #tpu.memory_space<vmem>>, vector<1x32xf32>
    %c0_3 = arith.constant 0 : index
    %c0_4 = arith.constant 0 : index
    %2 = vector.load %arg3[%c0_3, %c0_4] : memref<1x32xf32, #tpu.memory_space<vmem>>, vector<1x32xf32>
    %cst = arith.constant dense<0.000000e+00> : vector<16xf32>
    %3 = vector.multi_reduction <add>, %0, %cst [1] : vector<16x32xf32> to vector<16xf32>
    %4 = vector.shape_cast %3 : vector<16xf32> to vector<16x1xf32>
    %cst_5 = arith.constant 3.200000e+01 : f32
    %5 = vector.broadcast %cst_5 : f32 to vector<16x1xf32>
    %6 = arith.divf %4, %5 : vector<16x1xf32>
    %7 = vector.broadcast %6 : vector<16x1xf32> to vector<16x32xf32>
    %8 = arith.subf %0, %7 : vector<16x32xf32>
    %9 = arith.mulf %8, %8 : vector<16x32xf32>
    %cst_6 = arith.constant dense<0.000000e+00> : vector<16xf32>
    %10 = vector.multi_reduction <add>, %9, %cst_6 [1] : vector<16x32xf32> to vector<16xf32>
    %11 = vector.shape_cast %10 : vector<16xf32> to vector<16x1xf32>
    %cst_7 = arith.constant 3.200000e+01 : f32
    %12 = vector.broadcast %cst_7 : f32 to vector<16x1xf32>
    %13 = arith.divf %11, %12 : vector<16x1xf32>
    %14 = vector.broadcast %6 : vector<16x1xf32> to vector<16x32xf32>
    %15 = arith.subf %0, %14 : vector<16x32xf32>
    %cst_8 = arith.constant 9.99999974E-6 : f32
    %16 = vector.broadcast %cst_8 : f32 to vector<16x1xf32>
    %17 = arith.addf %13, %16 : vector<16x1xf32>
    %18 = math.rsqrt %17 : vector<16x1xf32>
    %19 = vector.broadcast %18 : vector<16x1xf32> to vector<16x32xf32>
    %20 = arith.mulf %15, %19 : vector<16x32xf32>
    %21 = vector.broadcast %1 : vector<1x32xf32> to vector<16x32xf32>
    %22 = arith.mulf %20, %21 : vector<16x32xf32>
    %23 = vector.broadcast %2 : vector<1x32xf32> to vector<16x32xf32>
    %24 = arith.addf %22, %23 : vector<16x32xf32>
    %25 = arith.truncf %24 : vector<16x32xf32> to vector<16x32xbf16>
    %c0_9 = arith.constant 0 : index
    %c0_10 = arith.constant 0 : index
    %26 = vector.load %arg4[%c0_9, %c0_10] : memref<32x96xbf16, #tpu.memory_space<vmem>>, vector<32x96xbf16>
    %cst_11 = arith.constant dense<0.000000e+00> : vector<16x96xf32>
    %27 = tpu.matmul %25, %26, %cst_11 {dimension_numbers = #tpu.dot_dimension_numbers<[1], [0], [0], [1], [0, 0, 1, 1], [], []>} : vector<16x32xbf16>, vector<32x96xbf16>, vector<16x96xf32> -> vector<16x96xf32>
    %c0_12 = arith.constant 0 : index
    %c0_13 = arith.constant 0 : index
    %28 = vector.load %arg5[%c0_12, %c0_13] : memref<16x96xf32, #tpu.memory_space<vmem>>, vector<16x96xf32>
    tpu.vector_store %arg5[%c0_12, %c0_13], %27 {strides = array<i32>} : memref<16x96xf32, #tpu.memory_space<vmem>>, vector<16x96xf32>,
    return
  }
  func.func @transform_0(%arg0: i32) -> (i32, i32) {
    %c0_i32 = arith.constant 0 : i32
    %c0_i32_0 = arith.constant 0 : i32
    return %arg0, %c0_i32 : i32, i32
  }
  func.func @transform_1(%arg0: i32) -> (i32, i32) {
    %c0_i32 = arith.constant 0 : i32
    %c0_i32_0 = arith.constant 0 : i32
    %c0_i32_1 = arith.constant 0 : i32
    return %c0_i32, %c0_i32_0 : i32, i32
  }
  func.func @transform_2(%arg0: i32) -> (i32, i32) {
    %c0_i32 = arith.constant 0 : i32
    %c0_i32_0 = arith.constant 0 : i32
    %c0_i32_1 = arith.constant 0 : i32
    return %c0_i32, %c0_i32_0 : i32, i32
  }
  func.func @transform_3(%arg0: i32) -> (i32, i32) {
    %c0_i32 = arith.constant 0 : i32
    %c0_i32_0 = arith.constant 0 : i32
    %c0_i32_1 = arith.constant 0 : i32
    return %c0_i32, %c0_i32_0 : i32, i32
  }
  func.func @transform_4(%arg0: i32) -> (i32, i32) {
    %c0_i32 = arith.constant 0 : i32
    %c0_i32_0 = arith.constant 0 : i32
    return %arg0, %c0_i32 : i32, i32
  }
}

</mosaic_0001>

<bundles_post_ra>
// kernel: tpu_custom_call.1
= control target key start
LH: loop header
LB: loop body
LE: loop exit
PB: predicated region body
PF: predicated region fallthrough
CT: control target
= control target key end

     0   :  { %9 = vsyncpa [#allocation3], 0  ;;  %s367_s0 = inlined_call_operand.hbm [shape: f32[16,32], index: 0, kind: input, shape index: {}]   ;;  %s368_s1 = inlined_call_operand.vmem [shape: f32[1,32], index: 1, kind: input, shape index: {}]   ;;  %s369_s2 = inlined_call_operand.vmem [shape: f32[1,32], index: 2, kind: input, shape index: {}]   ;;  %s370_s3 = inlined_call_operand.hbm [shape: bf16[32,96], index: 3, kind: input, shape index: {}]   ;;  %s371_s4 = inlined_call_operand.hbm [shape: f32[16,96], index: 4, kind: output, shape index: {}]  }
   0x1   :  { %10 = vsyncpa [#allocation6], 0 }
   0x2   :  { %11 = vsyncpa [#allocation4], 0  ;;  %s280_s15 = smov [#allocation2]   ;;  %s208_s19 = scalar_lea.hbm %s367_s0, 256 }
   0x3   :  { %s17_s16 = sshll.u32 %s280_s15, 4  ;;  %p209_p0 = scmp.ne.s32.totalorder %s367_s0, %s208_s19  ;;  %s18_s16 = int_to_ptr.vmem [resolvable:$true] %s17_s16 }
   0x4   :  { %p212_p1 = scmp.lt.u32.totalorder %s208_s19, %s367_s0 }
   0x6   :  { %p214_p2 = pnand %p212_p1, %p209_p0 }
   0x8   :  { %217 = shalt.err (!%p214_p2)
}
   0x9   :  { %s218_s24 = scalar_lea.vmem %s18_s16, 256  ;;  %p223_p4 = scmp.lt.s32.totalorder %s18_s16, %s18_s16 }
   0xa   :  { %p219_p3 = scmp.ne.s32.totalorder %s18_s16, %s218_s24  ;;  %p224_p5 = scmp.lt.s32.totalorder %s218_s24, %s218_s24 }
   0xc   :  { %p225_p6 = por %p224_p5, %p223_p4 }
   0xe   :  { %p226_p7 = pnand %p225_p6, %p219_p3 }
  0x10   :  { %229 = shalt.err (!%p226_p7)
}
  0x11   :  { %s281_s25 = smov 128   ;;  %s282_s26 = smov 8  }
  0x12   :  { %23 = dma.hbm_to_vmem [thread:$0]  %s367_s0, 256, %s18_s16, [#allocation3], %s281_s25, %s281_s25, %s282_s26  }
  0x13   :  { %s283_s29 = smov [#allocation5]   ;;  %s230_s7 = scalar_lea.hbm %s370_s3, 256 }
  0x14   :  { %s33_s30 = sshll.u32 %s283_s29, 4  ;;  %p231_p8 = scmp.ne.s32.totalorder %s370_s3, %s230_s7  ;;  %s34_s30 = int_to_ptr.vmem [resolvable:$true] %s33_s30 }
  0x15   :  { %p234_p9 = scmp.lt.u32.totalorder %s230_s7, %s370_s3 }
  0x17   :  { %p236_p10 = pnand %p234_p9, %p231_p8 }
  0x19   :  { %239 = shalt.err (!%p236_p10)
}
  0x1a   :  { %s240_s12 = scalar_lea.vmem %s34_s30, 256  ;;  %p245_p12 = scmp.lt.s32.totalorder %s34_s30, %s34_s30 }
  0x1b   :  { %p241_p11 = scmp.ne.s32.totalorder %s34_s30, %s240_s12  ;;  %p246_p13 = scmp.lt.s32.totalorder %s240_s12, %s240_s12 }
  0x1d   :  { %p247_p0 = por %p246_p13, %p245_p12 }
  0x1f   :  { %p248_p1 = pnand %p247_p0, %p241_p11 }
  0x21   :  { %251 = shalt.err (!%p248_p1)
}
  0x22   :  { %s284_s0 = smov 64   ;;  %s285_s13 = smov 4  }
  0x23   :  { %39 = dma.hbm_to_vmem [thread:$0]  %s370_s3, 256, %s34_s30, [#allocation6], %s284_s0, %s284_s0, %s285_s13  }
  0x24   :  { %274 = dma.done.wait [#allocation3], 256  }
  0x25   :  { %275 = vsyncadd [#allocation3], 4294967040 }
  0x26   :  { %276 = dma.done.wait [#allocation6], 256  }
  0x27   :  { %277 = vsyncadd [#allocation6], 4294967040  ;;  %vm51_vm0 = vcmask 261120   ;;  %v47_v0 = vld [vmem:[#allocation2] sm:$0xff]  ;;  %v48_v1 = vld [vmem:[#allocation2 + $0x8] sm:$0xff]  ;;  %v286_v15 = vmov 0.0  }
  0x28   :  { %v52_v2 = vsel %vm51_vm0, %v47_v0, 0.0  ;;  %v55_v3 = vsel %vm51_vm0, %v48_v1, 0.0  ;;  %v202_v14 = vld [vmem:[#allocation5] sm:$0xff]   ;;  %185 = vmatprep.subr.bf16.mxu0 %v286_v15  ;;  %v203_v16 = vld [vmem:[#allocation5 + $0x8] sm:$0xff]   ;;  %vm287_vm1 = vmmov 0   ;;  %vm156_vm2 = vcmask 785408  }
  0x29   :  { %53 = vadd.xlane.f32.xlu0 %v52_v2  ;;  %186 = vmatpush3.bf16.msra.mxu0 %v202_v14  ;;  %v177_v25 = vld [vmem:[%s368_s1] ss:$0 sm:$0xff]  ;;  %s288_s19 = smov [#allocation7]  }
  0x2a   :  { %189 = vmatprep.mubr.msk.bf16.mxu0 %vm287_vm1, %v286_v15  ;;  %187 = vmatprep.subr.bf16.mxu0 %v286_v15  ;;  %v178_v29 = vld [vmem:[%s369_s2] ss:$0 sm:$0xff]  ;;  %s164_s20 = sshll.u32 %s288_s19, 4  ;;  %s165_s20 = int_to_ptr.vmem [resolvable:$true] %s164_s20 }
  0x2b   :  { %s252_s1 = scalar_lea.vmem %s165_s20, 256  ;;  %p257_p3 = scmp.lt.s32.totalorder %s165_s20, %s165_s20 }
  0x2c   :  { %p253_p2 = scmp.ne.s32.totalorder %s165_s20, %s252_s1  ;;  %p258_p4 = scmp.lt.s32.totalorder %s252_s1, %s252_s1 }
  0x2d   :  { %56 = vadd.xlane.f32.xlu0 %v55_v3  ;;  %188 = vmatpush3.bf16.msra.mxu0 %v203_v16 }
  0x2e   :  { %p259_p5 = por %p258_p4, %p257_p3 }
  0x30   :  { %p260_p6 = pnand %p259_p5, %p253_p2 }
  0xb6   :  { %v54_v4 = vpop.xlane.xlu0 %53 }
  0xb7   :  { %v59_v5 = vmul.f32 0.03125, %v54_v4 }
  0xb9   :  { %v61_v6 = vsub.f32 %v47_v0, %v59_v5 }
  0xba   :  { %v57_v7 = vpop.xlane.xlu0 %56 }
  0xbb   :  { %v60_v8 = vmul.f32 0.03125, %v57_v7  ;;  %v63_v9 = vmul.f32 %v61_v6, %v61_v6 }
  0xbd   :  { %v62_v10 = vsub.f32 %v48_v1, %v60_v8  ;;  %v65_v11 = vsel %vm51_vm0, %v63_v9, 0.0 }
  0xbe   :  { %66 = vadd.xlane.f32.xlu1 %v65_v11 }
  0xbf   :  { %v64_v12 = vmul.f32 %v62_v10, %v62_v10 }
  0xc1   :  { %v68_v13 = vsel %vm51_vm0, %v64_v12, 0.0 }
  0xc2   :  { %69 = vadd.xlane.f32.xlu1 %v68_v13 }
 0x14b   :  { %v67_v17 = vpop.xlane.xlu1 %66 }
 0x14c   :  { %v71_v18 = vmul.f32 0.03125, %v67_v17 }
 0x14e   :  { %v73_v19 = vadd.f32 1e-05, %v71_v18 }
 0x14f   :  { %v70_v20 = vpop.xlane.xlu1 %69 }
 0x150   :  { %204 = vrsqrt.f32 %v73_v19  ;;  %v72_v21 = vmul.f32 0.03125, %v70_v20 }
 0x152   :  { %v74_v22 = vadd.f32 1e-05, %v72_v21 }
 0x154   :  { %206 = vrsqrt.f32 %v74_v22 }
 0x15a   :  { %v205_v23 = vpop.eup %204 }
 0x15b   :  { %v77_v24 = vmul.f32 %v205_v23, %v61_v6 }
 0x15d   :  { %v85_v28 = vmul.f32 %v177_v25, %v77_v24 }
 0x15e   :  { %v207_v26 = vpop.eup %206 }
 0x15f   :  { %v78_v27 = vmul.f32 %v207_v26, %v62_v10  ;;  %v93_v31 = vadd.f32 %v178_v29, %v85_v28 }
 0x161   :  { %v86_v30 = vmul.f32 %v177_v25, %v78_v27 }
 0x163   :  { %v94_v32 = vadd.f32 %v178_v29, %v86_v30 }
 0x165   :  { %v95_v33 = vpack.c.bf16 %v94_v32, %v93_v31 }
 0x167   :  { %190 = vmatmul.mubr.msk.bf16.vlgmr.msra.gmra.mrb[0].mxu0 %vm51_vm0, %v95_v33 }
 0x23a   :  { %v149_v34 = vpop.f32.mrb[0].mxu0 }
 0x23b   :  { %157 = vst.msk [vmem:[#allocation7] sm:$0xff] %vm156_vm2, %v149_v34  ;;  %v191_v35 = vpop.f32.mrb[1].mxu0 }
 0x23c   :  { %v152_v36 = vpop.f32.mrb[2].mxu0 }
 0x23d   :  { %158 = vst.msk [vmem:[#allocation7 + $0x8] sm:$0xff] %vm156_vm2, %v152_v36  ;;  %v192_v37 = vpop.f32.mrb[3].mxu0 }
 0x23e   :  { %263 = shalt.err (!%p260_p6)
}
 0x23f   :  { %s264_s22 = scalar_lea.hbm %s371_s4, 256 }
 0x240   :  { %p265_p7 = scmp.ne.s32.totalorder %s371_s4, %s264_s22  ;;  %p268_p8 = scmp.lt.u32.totalorder %s264_s22, %s371_s4 }
 0x242   :  { %p270_p9 = pnand %p268_p8, %p265_p7 }
 0x244   :  { %273 = shalt.err (!%p270_p9)
}
 0x245   :  { %170 = dma.vmem_to_hbm [thread:$0]  %s165_s20, 256, %s371_s4, [#allocation4], %s281_s25, %s281_s25, %s282_s26  }
 0x246   :  { %278 = dma.done.wait [#allocation4], 256  }
 0x247   :  { %279 = vsyncadd [#allocation4], 4294967040 }
 0x248   :  { %174 = vsyncpa [#allocation3], 1 }
 0x249   :  { %175 = vsyncpa [#allocation6], 1 }
 0x24a   :  { %176 = vsyncpa [#allocation4], 1 }

</bundles_post_ra>
